<compile_context>
chip_gen: v6e
topology: v6e:2x2x1
jax: 0.10.0
libtpu: 0.0.40
codegen_flags: <defaults>
</compile_context>

<pallas_src>
import jax
import jax.numpy as jnp
from jax.experimental import pallas as pl
from jax.experimental.pallas import tpu as pltpu


def _round_up(v, m):
    return ((v + m - 1) // m) * m


# ------------------------------ kernel bodies --------------------------------

def _rbf_tile_kernel_single(params_ref, asq_r_ref, asq_c_ref, xr_ref, xct_ref, out_ref):
    """Single-pass (D fits one block) tile of outputscale * exp(-0.5 * d2 / ls^2).

    params_ref: SMEM f32[2] = [neg2a, b], neg2a = 1/ls^2, b = log(outputscale)
    asq_r_ref:  VMEM f32[TM, 1]  = a*||x_i||^2 + b   (a = -0.5/ls^2)
    asq_c_ref:  VMEM f32[1, TN]  = a*||x_j||^2
    xr_ref:     VMEM f32[TM, TK] row block of x
    xct_ref:    VMEM f32[TK, TN] col block of x, pre-transposed
    out_ref:    VMEM f32[TM, TN]
    """
    neg2a = params_ref[0]
    b = params_ref[1]
    gram = jnp.dot(xr_ref[...], xct_ref[...], preferred_element_type=jnp.float32)
    # min(a*d2_raw + b, b) == a*max(d2_raw, 0) + b  (a < 0), i.e. gpytorch's clamp.
    arg = jnp.minimum(asq_r_ref[...] + asq_c_ref[...] + neg2a * gram, b)
    out_ref[...] = jnp.exp(arg)


def _rbf_tile_kernel_ktiled(params_ref, asq_r_ref, asq_c_ref, xr_ref, xct_ref,
                            out_ref, acc_ref):
    """K-tiled variant: grid axis 2 runs over feature-dim chunks ("arbitrary")."""
    k = pl.program_id(2)

    @pl.when(k == 0)
    def _():
        acc_ref[...] = jnp.zeros_like(acc_ref)

    acc_ref[...] += jnp.dot(xr_ref[...], xct_ref[...],
                            preferred_element_type=jnp.float32)

    @pl.when(k == pl.num_programs(2) - 1)
    def _():
        neg2a = params_ref[0]
        b = params_ref[1]
        arg = jnp.minimum(asq_r_ref[...] + asq_c_ref[...] + neg2a * acc_ref[...], b)
        out_ref[...] = jnp.exp(arg)


# ------------------------------ host wrapper ----------------------------------

def rbf_scale_covar(x, lengthscale, outputscale, *,
                    tile_m=512, tile_n=512, tile_k=512, max_single_tile=1024):
    """outputscale * RBF(x, x) via a tiled Pallas TPU kernel. Returns (N, N) f32."""
    x = x.astype(jnp.float32)
    n, d = x.shape

    # ---- adaptive padding / tile selection ----------------------------------
    # Rows (sublane dim): pad only to a multiple of 8 when one tile covers N,
    # otherwise tile at tile_m and round N up to a multiple of it.
    n_r = _round_up(max(n, 1), 8)
    if n_r <= max_single_tile:
        tm = n_r
    else:
        tm = tile_m
        n_r = _round_up(n, tm)

    # Cols (lane dim): pad only to a multiple of 128 when one tile covers N.
    n_c = _round_up(max(n, 1), 128)
    if n_c <= max_single_tile:
        tn = n_c
    else:
        tn = tile_n
        n_c = _round_up(n, tn)

    # Feature dim: single pass when it fits one block, else K-tile (zero-pad D).
    if d <= tile_k:
        tk = d
        d_pad = d
    else:
        tk = tile_k
        d_pad = _round_up(d, tk)
    k_steps = d_pad // tk

    # ---- operands ------------------------------------------------------------
    # Row operand (n_r, d_pad); column operand pre-transposed to (d_pad, n_c) so the
    # in-kernel dot needs no per-tile transpose.  Zero-padding is exact (adds nothing
    # to dot products or norms); padded rows/cols are sliced off at the end.
    if (n_r, d_pad) == (n, d):
        x_row = x
    else:
        x_row = jnp.zeros((n_r, d_pad), jnp.float32).at[:n, :d].set(x)
    if (n_c, d_pad) == (n, d):
        x_colT = x.T
    else:
        x_colT = jnp.zeros((n_c, d_pad), jnp.float32).at[:n, :d].set(x).T

    # Fold all scalars into one affine of the raw squared distance:
    #   K = exp(min(a*|xi|^2 + b + a*|xj|^2 + (-2a)*<xi,xj>, b)),
    # a = -0.5/ls^2, b = log(outputscale); min(..., b) == clamping d2 at 0.
    a = jnp.float32(-0.5) / (lengthscale * lengthscale)
    b = jnp.log(outputscale).astype(jnp.float32)
    neg2a = jnp.float32(-2.0) * a
    sq = jnp.sum(x * x, axis=-1)                                         # (n,)
    asq_row = jnp.zeros((n_r, 1), jnp.float32).at[:n, 0].set(a * sq + b)  # (n_r, 1)
    asq_col = jnp.zeros((1, n_c), jnp.float32).at[0, :n].set(a * sq)      # (1, n_c)
    params = jnp.stack([neg2a, b]).astype(jnp.float32)                    # SMEM f32[2]

    # VMEM budget (worst case, tm=tn=1024, tk=512): ~20 MiB << 48 MiB limit,
    # safe on v5e/v6e (128 MiB physical) and v7x (64 MiB physical).
    vmem_limit = 48 * 1024 * 1024

    if k_steps == 1:
        grid = (n_r // tm, n_c // tn)
        out = pl.pallas_call(
            _rbf_tile_kernel_single,
            out_shape=jax.ShapeDtypeStruct((n_r, n_c), jnp.float32),
            grid=grid,
            in_specs=[
                pl.BlockSpec(memory_space=pltpu.MemorySpace.SMEM),   # scalars
                pl.BlockSpec((tm, 1), lambda i, j: (i, 0)),          # a*sq + b (rows)
                pl.BlockSpec((1, tn), lambda i, j: (0, j)),          # a*sq     (cols)
                pl.BlockSpec((tm, tk), lambda i, j: (i, 0)),         # x row block
                pl.BlockSpec((tk, tn), lambda i, j: (0, j)),         # x^T col block
            ],
            out_specs=pl.BlockSpec((tm, tn), lambda i, j: (i, j)),
            compiler_params=pltpu.CompilerParams(
                dimension_semantics=("parallel", "parallel"),
                vmem_limit_bytes=vmem_limit,
            ),
        )(params, asq_row, asq_col, x_row, x_colT)
    else:
        grid = (n_r // tm, n_c // tn, k_steps)
        out = pl.pallas_call(
            _rbf_tile_kernel_ktiled,
            out_shape=jax.ShapeDtypeStruct((n_r, n_c), jnp.float32),
            grid=grid,
            in_specs=[
                pl.BlockSpec(memory_space=pltpu.MemorySpace.SMEM),
                pl.BlockSpec((tm, 1), lambda i, j, k: (i, 0)),
                pl.BlockSpec((1, tn), lambda i, j, k: (0, j)),
                pl.BlockSpec((tm, tk), lambda i, j, k: (i, k)),
                pl.BlockSpec((tk, tn), lambda i, j, k: (k, j)),
            ],
            out_specs=pl.BlockSpec((tm, tn), lambda i, j, k: (i, j)),
            scratch_shapes=[pltpu.VMEM((tm, tn), jnp.float32)],
            compiler_params=pltpu.CompilerParams(
                dimension_semantics=("parallel", "parallel", "arbitrary"),
                vmem_limit_bytes=vmem_limit,
            ),
        )(params, asq_row, asq_col, x_row, x_colT)

    return out[:n, :n]


def ensure_positive_definite(covar, eps=1e-6):
    """Mirror the PyTorch while-loop (add eps*I until all eigenvalues > eps), with a
    single eigendecomposition: adding k*eps*I shifts every eigenvalue by exactly
    k*eps, so the loop's iteration count has a closed form."""
    # TODO(synk): eigvalsh has no Pallas equivalent; runs as a plain XLA op (this is
    # also the end-to-end bottleneck for large N, not the Pallas covariance kernel).
    n = covar.shape[0]
    lam_min = jnp.min(jnp.linalg.eigvalsh(covar))
    deficit = jnp.asarray(eps, covar.dtype) - lam_min
    k = jnp.where(lam_min > eps, 0.0, jnp.floor(deficit / eps) + 1.0).astype(covar.dtype)
    return covar + (k * jnp.asarray(eps, covar.dtype)) * jnp.eye(n, dtype=covar.dtype)


def kernel_forward(x, raw_lengthscale=0.0, raw_outputscale=0.0):
    """Equivalent of Kernel(device, kernel='rbf').forward(x).

    gpytorch default: constrained param = softplus(raw param), raw init = 0.0.
    """
    lengthscale = jax.nn.softplus(jnp.float32(raw_lengthscale))  # = ln(2)
    outputscale = jax.nn.softplus(jnp.float32(raw_outputscale))  # = ln(2)
    covar = rbf_scale_covar(x, lengthscale, outputscale)
    # Tile (i, j) and tile (j, i) execute identical dot/add sequences, so the result
    # is symmetric by construction — no host-side symmetrization pass.
    return ensure_positive_definite(covar)


if __name__ == "__main__":
    ls = jax.nn.softplus(jnp.float32(0.0))
    os_ = jax.nn.softplus(jnp.float32(0.0))

    def ref_covar(xx):
        xs = xx / ls
        sqn = jnp.sum(xs * xs, axis=-1)
        d2 = jnp.maximum(sqn[:, None] + sqn[None, :] - 2.0 * (xs @ xs.T), 0.0)
        return os_ * jnp.exp(-0.5 * d2)

    # ---- test 1: small N / small D (single-pass path, tiny 8x128 padded tile) ----
    key = jax.random.PRNGKey(0)
    N, D = 8, 32
    x = jax.random.normal(key, (N, D), dtype=jnp.float32)

    covar_x = kernel_forward(x)
    jax.block_until_ready(covar_x)

    assert covar_x.shape == (N, N)
    assert bool(jnp.all(jnp.isfinite(covar_x)))
    # Diagonal of an RBF kernel scaled by softplus(0): ~ln(2) everywhere.
    assert bool(jnp.allclose(jnp.diag(covar_x), jnp.log(2.0), atol=1e-4))
    # Reference check (jitter <= a few 1e-6 is within tolerance).
    assert bool(jnp.allclose(covar_x, ref_covar(x), atol=1e-4))

    # ---- test 2: non-aligned N, D > tile_k (K-tiled accumulator path) ------------
    N2, D2 = 64, 600
    x2 = 0.1 * jax.random.normal(jax.random.PRNGKey(1), (N2, D2), dtype=jnp.float32)
    covar2 = rbf_scale_covar(x2, ls, os_)
    jax.block_until_ready(covar2)

    assert covar2.shape == (N2, N2)
    assert bool(jnp.all(jnp.isfinite(covar2)))
    assert bool(jnp.allclose(covar2, covar2.T, atol=1e-3))
    assert bool(jnp.allclose(covar2, ref_covar(x2), atol=1e-4))

    print("KERNEL_OK")
</pallas_src>

<mosaic_0001>
module attributes {stable_mosaic.version = 11 : i64} {
  func.func @_rbf_tile_kernel_single(%arg0: i32, %arg1: i32, %arg2: memref<2xf32, #tpu.memory_space<smem>>, %arg3: memref<8x1xf32, #tpu.memory_space<vmem>>, %arg4: memref<1x128xf32, #tpu.memory_space<vmem>>, %arg5: memref<8x32xf32, #tpu.memory_space<vmem>>, %arg6: memref<32x128xf32, #tpu.memory_space<vmem>>, %arg7: memref<8x128xf32, #tpu.memory_space<vmem>>) attributes {dimension_semantics = [#tpu.dimension_semantics<parallel>, #tpu.dimension_semantics<parallel>], iteration_bounds = array<i64: 1, 1>, scalar_prefetch = 0 : i64, scratch_operands = 0 : i64, tpu.core_type = #tpu.core_type<tc>, window_params = [{transform_indices = @transform_0, window_bounds = array<i64: 2>}, {transform_indices = @transform_1, window_bounds = array<i64: 8, 1>}, {transform_indices = @transform_2, window_bounds = array<i64: 1, 128>}, {transform_indices = @transform_3, window_bounds = array<i64: 8, 32>}, {transform_indices = @transform_4, window_bounds = array<i64: 32, 128>}, {transform_indices = @transform_5, window_bounds = array<i64: 8, 128>}]} {
    %c0 = arith.constant 0 : index
    %0 = memref.load %arg2[%c0] : memref<2xf32, #tpu.memory_space<smem>>
    %c1 = arith.constant 1 : index
    %1 = memref.load %arg2[%c1] : memref<2xf32, #tpu.memory_space<smem>>
    %c0_0 = arith.constant 0 : index
    %c0_1 = arith.constant 0 : index
    %2 = vector.load %arg5[%c0_0, %c0_1] : memref<8x32xf32, #tpu.memory_space<vmem>>, vector<8x32xf32>
    %c0_2 = arith.constant 0 : index
    %c0_3 = arith.constant 0 : index
    %3 = vector.load %arg6[%c0_2, %c0_3] : memref<32x128xf32, #tpu.memory_space<vmem>>, vector<32x128xf32>
    %cst = arith.constant dense<0.000000e+00> : vector<8x128xf32>
    %4 = tpu.matmul %2, %3, %cst {dimension_numbers = #tpu.dot_dimension_numbers<[1], [0], [0], [1], [0, 0, 1, 1], [], []>} : vector<8x32xf32>, vector<32x128xf32>, vector<8x128xf32> -> vector<8x128xf32>
    %c0_4 = arith.constant 0 : index
    %c0_5 = arith.constant 0 : index
    %5 = vector.load %arg3[%c0_4, %c0_5] : memref<8x1xf32, #tpu.memory_space<vmem>>, vector<8x1xf32>
    %c0_6 = arith.constant 0 : index
    %c0_7 = arith.constant 0 : index
    %6 = vector.load %arg4[%c0_6, %c0_7] : memref<1x128xf32, #tpu.memory_space<vmem>>, vector<1x128xf32>
    %7 = vector.broadcast %5 : vector<8x1xf32> to vector<8x128xf32>
    %8 = vector.broadcast %6 : vector<1x128xf32> to vector<8x128xf32>
    %9 = arith.addf %7, %8 : vector<8x128xf32>
    %10 = vector.broadcast %0 : f32 to vector<8x128xf32>
    %11 = arith.mulf %10, %4 : vector<8x128xf32>
    %12 = arith.addf %9, %11 : vector<8x128xf32>
    %13 = vector.broadcast %1 : f32 to vector<8x128xf32>
    %14 = arith.minimumf %12, %13 : vector<8x128xf32>
    %15 = math.exp %14 : vector<8x128xf32>
    %c0_8 = arith.constant 0 : index
    %c0_9 = arith.constant 0 : index
    %16 = vector.load %arg7[%c0_8, %c0_9] : memref<8x128xf32, #tpu.memory_space<vmem>>, vector<8x128xf32>
    tpu.vector_store %arg7[%c0_8, %c0_9], %15 {strides = array<i32>} : memref<8x128xf32, #tpu.memory_space<vmem>>, vector<8x128xf32>,
    return
  }
  func.func @transform_0(%arg0: i32, %arg1: i32) -> i32 {
    %c0_i32 = arith.constant 0 : i32
    %c0_i32_0 = arith.constant 0 : i32
    return %c0_i32 : i32
  }
  func.func @transform_1(%arg0: i32, %arg1: i32) -> (i32, i32) {
    %c0_i32 = arith.constant 0 : i32
    %c0_i32_0 = arith.constant 0 : i32
    return %arg0, %c0_i32 : i32, i32
  }
  func.func @transform_2(%arg0: i32, %arg1: i32) -> (i32, i32) {
    %c0_i32 = arith.constant 0 : i32
    %c0_i32_0 = arith.constant 0 : i32
    return %c0_i32, %arg1 : i32, i32
  }
  func.func @transform_3(%arg0: i32, %arg1: i32) -> (i32, i32) {
    %c0_i32 = arith.constant 0 : i32
    %c0_i32_0 = arith.constant 0 : i32
    return %arg0, %c0_i32 : i32, i32
  }
  func.func @transform_4(%arg0: i32, %arg1: i32) -> (i32, i32) {
    %c0_i32 = arith.constant 0 : i32
    %c0_i32_0 = arith.constant 0 : i32
    return %c0_i32, %arg1 : i32, i32
  }
  func.func @transform_5(%arg0: i32, %arg1: i32) -> (i32, i32) {
    %c0_i32 = arith.constant 0 : i32
    return %arg0, %arg1 : i32, i32
  }
}

</mosaic_0001>

<bundles_post_ra>
// kernel: tpu_custom_call.1
= control target key start
LH: loop header
LB: loop body
LE: loop exit
PB: predicated region body
PF: predicated region fallthrough
CT: control target
= control target key end

     0   :  { %10 = vsyncpa [#allocation5], 0  ;;  %s311_s0 = inlined_call_operand.vmem [shape: f32[2], index: 0, kind: input, shape index: {}]   ;;  %s312_s1 = inlined_call_operand.vmem [shape: f32[8,1], index: 1, kind: input, shape index: {}]   ;;  %s313_s2 = inlined_call_operand.vmem [shape: f32[1,128], index: 2, kind: input, shape index: {}]   ;;  %s314_s3 = inlined_call_operand.vmem [shape: f32[8,32], index: 3, kind: input, shape index: {}]   ;;  %s315_s4 = inlined_call_operand.hbm [shape: f32[32,128], index: 4, kind: input, shape index: {}]   ;;  %s316_s5 = inlined_call_operand.hbm [shape: f32[8,128], index: 5, kind: output, shape index: {}]  }
   0x1   :  { %11 = vsyncpa [#allocation3], 0 }
   0x2   :  { %12 = vsyncpa [#allocation4], 0  ;;  %s19_s20 = sshll.u32 %s311_s0, 4  ;;  %s20_s20 = int_to_ptr.vmem [resolvable:$true] %s19_s20 }
   0x3   :  { %s197_s21 = scalar_lea.vmem %s20_s20, 16  ;;  %p202_p1 = scmp.lt.s32.totalorder %s20_s20, %s20_s20 }
   0x4   :  { %p198_p0 = scmp.ne.s32.totalorder %s20_s20, %s197_s21  ;;  %p203_p2 = scmp.lt.s32.totalorder %s197_s21, %s197_s21 }
   0x6   :  { %p204_p3 = por %p203_p2, %p202_p1 }
   0x8   :  { %p205_p4 = pnand %p204_p3, %p198_p0 }
   0xa   :  { %208 = shalt.err (!%p205_p4)
}
   0xb   :  { %s255_s22 = smov [#allocation2]   ;;  %s256_s23 = smov [#allocation6]  }
   0xc   :  { %22 = dma.vmem_to_smem %s20_s20, 16, %s255_s22, [#allocation5]  }
   0xd   :  { %s34_s24 = sshll.u32 %s256_s23, 4  ;;  %s35_s24 = int_to_ptr.vmem [resolvable:$true] %s34_s24 }
   0xe   :  { %s217_s25 = scalar_lea.vmem %s35_s24, 512  ;;  %p222_p6 = scmp.lt.s32.totalorder %s35_s24, %s35_s24 }
   0xf   :  { %p218_p5 = scmp.ne.s32.totalorder %s35_s24, %s217_s25  ;;  %p223_p7 = scmp.lt.s32.totalorder %s217_s25, %s217_s25 }
  0x11   :  { %p224_p8 = por %p223_p7, %p222_p6 }
  0x13   :  { %p225_p9 = pnand %p224_p8, %p218_p5 }
  0x15   :  { %228 = shalt.err (!%p225_p9)
}
  0x16   :  { %s257_s0 = smov 128   ;;  %s258_s26 = smov 8  }
  0x17   :  { %40 = dma.hbm_to_vmem [thread:$0]  %s315_s4, 512, %s35_s24, [#allocation3], %s257_s0, %s257_s0, %s258_s26  }
  0x18   :  { %249 = dma.done.wait [#allocation5], 16  }
  0x19   :  { %250 = vsyncadd [#allocation5], 4294967280 }
  0x1a   :  { %251 = dma.done.wait [#allocation3], 512  }
  0x1b   :  { %252 = vsyncadd [#allocation3], 4294966784 }
  0x1c   :  { %47 = sfence }
  0x1d   :  { %v54_v0 = vld [vmem:[#allocation6 + $0x18] sm:$0xff]  ;;  %v259_v1 = vmov 0.0   ;;  %v53_v2 = vld [vmem:[#allocation6 + $0x10] sm:$0xff]  ;;  %vm260_vm0 = vmmov 0   ;;  %v129_v3 = vld [vmem:[%s312_s1] sm:$0xff]  ;;  %v261_v4 = vmov 0  }
  0x1e   :  { %175 = vmatprep.subr.mxu0 %v259_v1  ;;  %183 = vmatprep.mubr.msk.f32.mxu0 %vm260_vm0, %v259_v1  ;;  %v52_v5 = vld [vmem:[#allocation6 + $0x8] sm:$0xff]  ;;  %v51_v6 = vld [vmem:[#allocation6] sm:$0xff]  ;;  %vm55_vm1 = vcmask 261120   ;;  %s48_s7 = sld [smem:[#allocation2]] }
  0x1f   :  { %176 = vmatpush3.msra.mxu0 %v54_v0  ;;  %194 = vset.pattern.permute.xlu0 %v261_v4  ;;  %v50_v7 = vld [vmem:[%s314_s3] sm:$0xff]  ;;  %s167_s1 = sld [smem:[#allocation2 + $0x1]]  ;;  %s262_s3 = smov [#allocation7]  }
  0x20   :  { %177 = vmatprep.subr.mxu0 %v259_v1  ;;  %133 = vperm.xlu0 %194, %v129_v3   ;;  %v169_v8 = vld [vmem:[%s313_s2] ss:$0 sm:$0xff]  ;;  %s157_s10 = sshll.u32 %s262_s3, 4  ;;  %s158_s10 = int_to_ptr.vmem [resolvable:$true] %s157_s10 }
  0x21   :  { %178 = vmatpush3.msra.mxu0 %v53_v2  ;;  %s229_s11 = scalar_lea.vmem %s158_s10, 128  ;;  %p234_p11 = scmp.lt.s32.totalorder %s158_s10, %s158_s10 }
  0x22   :  { %179 = vmatprep.subr.mxu0 %v259_v1  ;;  %p230_p10 = scmp.ne.s32.totalorder %s158_s10, %s229_s11  ;;  %p235_p12 = scmp.lt.s32.totalorder %s229_s11, %s229_s11 }
  0x23   :  { %180 = vmatpush3.msra.mxu0 %v52_v5 }
  0x24   :  { %181 = vmatprep.subr.mxu0 %v259_v1  ;;  %v143_v10 = vstv %s48_s7  ;;  %p236_p13 = por %p235_p12, %p234_p11 }
  0x25   :  { %182 = vmatpush3.msra.mxu0 %v51_v6  ;;  %v146_v14 = vstv %s167_s1 }
  0x26   :  { %184 = vmatmul.mubr.msk.f32.vlgmr.msra.gmra.mxu0 %vm55_vm1, %v50_v7  ;;  %p237_p0 = pnand %p236_p13, %p230_p10 }
  0x9b   :  { %v134_v9 = vpop.permute.xlu0 %133 }
  0x9c   :  { %v142_v11 = vadd.f32 %v169_v8, %v134_v9 }
  0xe6   :  { %v125_v12 = vpop.f32.mrf.mxu0 }
  0xe7   :  { %v144_v13 = vmul.f32 %v143_v10, %v125_v12 }
  0xe8   :  { %v185_v15 = vpop.f32.mrf.mxu0 }
  0xe9   :  { %v145_v16 = vadd.f32 %v144_v13, %v142_v11 }
  0xeb   :  { %v147_v17 = vmin.f32 %v145_v16, %v146_v14 }
  0xed   :  { %v148_v18 = vmul.f32 1.442695, %v147_v17 }
  0xef   :  { %195 = vpow2.f32 %v148_v18 }
  0xfc   :  { %v196_v19 = vpop.eup %195 }
  0xfd   :  { %150 = vst [vmem:[#allocation7] sm:$0xff] %v196_v19 }
  0xfe   :  { %240 = shalt.err (!%p237_p0)
}
  0xff   :  { %160 = dma.vmem_to_hbm [thread:$0]  %s158_s10, 128, %s316_s5, [#allocation4]  }
 0x100   :  { %253 = dma.done.wait [#allocation4], 128  }
 0x101   :  { %254 = vsyncadd [#allocation4], 4294967168 }
 0x102   :  { %164 = vsyncpa [#allocation3], 1 }
 0x103   :  { %165 = vsyncpa [#allocation4], 1 }
 0x104   :  { %166 = vsyncpa [#allocation5], 1 }

</bundles_post_ra>
